<compile_context>
chip_gen: v7x
topology: tpu7x:2x2x1
jax: 0.10.0
libtpu: 0.0.40
codegen_flags: <defaults>
</compile_context>

<pallas_src>
import functools

import numpy as np
import jax
import jax.numpy as jnp
from jax import lax
from jax.experimental import pallas as pl
from jax.experimental.pallas import tpu as pltpu


def lstm_fc_kernel(x_ref, wih_ref, whh_ref, b_ref, wfc_ref, bfc_ref, out_ref):
    """Whole LSTM recurrence + final Linear in a single grid step.

    x_ref  : (T*Bp, I)   time-major input, batch zero-padded to Bp sublanes
    wih_ref: (I, 4H)     input->gates weights (PyTorch gate order i,f,g,o)
    whh_ref: (H, 4H)     hidden->gates weights
    b_ref  : (1, 4H)     combined bias (b_ih + b_hh)
    wfc_ref: (H, 128)    final linear weight, lane-padded (cols >= 2 are zero)
    bfc_ref: (1, 128)    final linear bias, lane-padded
    out_ref: (Bp, 128)   lane-dense output; wrapper slices [:B, :2]
    """
    H = whh_ref.shape[0]
    Bp = out_ref.shape[0]
    T = x_ref.shape[0] // Bp

    w_hh = whh_ref[...]

    # Input projection for ALL timesteps (+ bias) in one MXU matmul, hoisted
    # off the sequential critical path:  (T*Bp, I) @ (I, 4H) -> (T*Bp, 4H).
    gates_x = (jnp.dot(x_ref[...], wih_ref[...],
                       preferred_element_type=jnp.float32) + b_ref[...])

    # Per-lane constants so all four gates go through a single tanh pass over
    # the full (Bp, 4H) tile: sigmoid(z) = 0.5*tanh(0.5*z) + 0.5 for the
    # i/f/o lanes, plain tanh for the g lanes.
    lane = lax.broadcasted_iota(jnp.int32, (1, 4 * H), 1)
    is_g = jnp.logical_and(lane >= 2 * H, lane < 3 * H)
    pre_scale = jnp.where(is_g, 1.0, 0.5).astype(jnp.float32)
    post_mul = pre_scale
    post_add = jnp.where(is_g, 0.0, 0.5).astype(jnp.float32)

    h = jnp.zeros((Bp, H), jnp.float32)
    c = jnp.zeros((Bp, H), jnp.float32)

    # T is tiny: fully unrolled recurrence, static sublane-aligned slices
    # (Bp is a multiple of 8); one MXU push (h @ W_hh) per step.
    for t in range(T):
        gates = gates_x[t * Bp:(t + 1) * Bp, :] + jnp.dot(
            h, w_hh, preferred_element_type=jnp.float32)
        act = jnp.tanh(gates * pre_scale) * post_mul + post_add
        i_g = act[:, 0 * H:1 * H]
        f_g = act[:, 1 * H:2 * H]
        g_g = act[:, 2 * H:3 * H]
        o_g = act[:, 3 * H:4 * H]
        c = f_g * c + i_g * g_g
        h = o_g * jnp.tanh(c)

    # Final Linear on the last hidden state; output is 128-lane dense
    # (columns >= 2 are zero because wfc/bfc are zero-padded).
    out_ref[...] = (jnp.dot(h, wfc_ref[...],
                            preferred_element_type=jnp.float32) + bfc_ref[...])


@jax.jit
def lstm_model_forward(x, w_ih_t, w_hh_t, b, w_fc_t, b_fc):
    """x: (B, T, I) float32 -> (B, 2) float32 (matches PyTorch LSTMModel)."""
    B, T, I = x.shape
    H = w_hh_t.shape[0]
    LANES = 128
    Bp = max(8, ((B + 7) // 8) * 8)  # full f32 sublanes

    # Zero-pad batch to Bp, go time-major, and flatten (T, Bp) -> T*Bp rows so
    # the input projection is a single matmul inside the kernel.
    x_pad = jnp.zeros((Bp, T, I), jnp.float32).at[:B].set(x)
    x_tm = jnp.transpose(x_pad, (1, 0, 2)).reshape(T * Bp, I)

    # Lane-dense FC params: pad the 2 output features out to 128 lanes.
    nf = w_fc_t.shape[1]
    w_fc_pad = jnp.zeros((H, LANES), jnp.float32).at[:, :nf].set(w_fc_t)
    b_fc_pad = jnp.zeros((1, LANES), jnp.float32).at[:, :nf].set(b_fc)

    out_pad = pl.pallas_call(
        lstm_fc_kernel,
        out_shape=jax.ShapeDtypeStruct((Bp, LANES), jnp.float32),
        grid_spec=pltpu.PrefetchScalarGridSpec(
            num_scalar_prefetch=0,
            grid=(1,),  # single step: whole recurrence runs in-kernel
            in_specs=[
                pl.BlockSpec((T * Bp, I), lambda i: (0, 0)),
                pl.BlockSpec((I, 4 * H), lambda i: (0, 0)),
                pl.BlockSpec((H, 4 * H), lambda i: (0, 0)),
                pl.BlockSpec((1, 4 * H), lambda i: (0, 0)),
                pl.BlockSpec((H, LANES), lambda i: (0, 0)),
                pl.BlockSpec((1, LANES), lambda i: (0, 0)),
            ],
            out_specs=pl.BlockSpec((Bp, LANES), lambda i: (0, 0)),
        ),
        compiler_params=pltpu.CompilerParams(
            dimension_semantics=("arbitrary",),
        ),
    )(x_tm, w_ih_t, w_hh_t, b, w_fc_pad, b_fc_pad)

    return out_pad[:B, :nf]


def ref_forward(x, w_ih_t, w_hh_t, b, w_fc_t, b_fc):
    """Pure-JAX reference mirroring torch.nn.LSTM + Linear semantics."""
    B, T, I = x.shape
    H = w_hh_t.shape[0]

    def step(carry, x_t):
        h, c = carry
        gates = x_t @ w_ih_t + h @ w_hh_t + b[0]
        i_g = jax.nn.sigmoid(gates[:, 0 * H:1 * H])
        f_g = jax.nn.sigmoid(gates[:, 1 * H:2 * H])
        g_g = jnp.tanh(gates[:, 2 * H:3 * H])
        o_g = jax.nn.sigmoid(gates[:, 3 * H:4 * H])
        c = f_g * c + i_g * g_g
        h = o_g * jnp.tanh(c)
        return (h, c), None

    init = (jnp.zeros((B, H), jnp.float32), jnp.zeros((B, H), jnp.float32))
    (h_last, _), _ = lax.scan(step, init, jnp.transpose(x, (1, 0, 2)))
    return h_last @ w_fc_t + b_fc[0]


if __name__ == "__main__":
    B, T, I, H = 2, 8, 16, 32  # batch, seq_len, input_size, hidden_size

    key = jax.random.PRNGKey(0)
    kx, k1, k2, k3, k4, k5, k6 = jax.random.split(key, 7)

    # Deterministic PyTorch-style uniform(-1/sqrt(H), 1/sqrt(H)) init.
    bound = 1.0 / np.sqrt(H)
    # Stored already transposed for right-multiplication; gate order [i,f,g,o].
    w_ih_t = jax.random.uniform(k1, (I, 4 * H), jnp.float32, -bound, bound)
    w_hh_t = jax.random.uniform(k2, (H, 4 * H), jnp.float32, -bound, bound)
    b_ih = jax.random.uniform(k3, (4 * H,), jnp.float32, -bound, bound)
    b_hh = jax.random.uniform(k4, (4 * H,), jnp.float32, -bound, bound)
    b = (b_ih + b_hh).reshape(1, 4 * H)

    w_fc_t = jax.random.uniform(k5, (H, 2), jnp.float32, -bound, bound)
    b_fc = jax.random.uniform(k6, (1, 2), jnp.float32, -bound, bound)

    x = jax.random.normal(kx, (B, T, I), jnp.float32)

    out = jax.block_until_ready(
        lstm_model_forward(x, w_ih_t, w_hh_t, b, w_fc_t, b_fc))
    ref = jax.block_until_ready(
        ref_forward(x, w_ih_t, w_hh_t, b, w_fc_t, b_fc))

    assert out.shape == (B, 2), out.shape
    np.testing.assert_allclose(np.asarray(out), np.asarray(ref),
                               rtol=1e-4, atol=1e-5)
    print("KERNEL_OK")
</pallas_src>

<mosaic_0001>
module attributes {stable_mosaic.version = 11 : i64} {
  func.func @lstm_fc_kernel(%arg0: i32, %arg1: memref<64x16xf32, #tpu.memory_space<vmem>>, %arg2: memref<16x128xf32, #tpu.memory_space<vmem>>, %arg3: memref<32x128xf32, #tpu.memory_space<vmem>>, %arg4: memref<1x128xf32, #tpu.memory_space<vmem>>, %arg5: memref<32x128xf32, #tpu.memory_space<vmem>>, %arg6: memref<1x128xf32, #tpu.memory_space<vmem>>, %arg7: memref<8x128xf32, #tpu.memory_space<vmem>>) attributes {dimension_semantics = [#tpu.dimension_semantics<arbitrary>], iteration_bounds = array<i64: 1>, scalar_prefetch = 0 : i64, scratch_operands = 0 : i64, tpu.core_type = #tpu.core_type<tc>, window_params = [{pipeline_mode = #tpu.pipeline_mode<synchronous>, transform_indices = @transform_0, window_bounds = array<i64: 64, 16>}, {pipeline_mode = #tpu.pipeline_mode<synchronous>, transform_indices = @transform_1, window_bounds = array<i64: 16, 128>}, {pipeline_mode = #tpu.pipeline_mode<synchronous>, transform_indices = @transform_2, window_bounds = array<i64: 32, 128>}, {pipeline_mode = #tpu.pipeline_mode<synchronous>, transform_indices = @transform_3, window_bounds = array<i64: 1, 128>}, {pipeline_mode = #tpu.pipeline_mode<synchronous>, transform_indices = @transform_4, window_bounds = array<i64: 32, 128>}, {pipeline_mode = #tpu.pipeline_mode<synchronous>, transform_indices = @transform_5, window_bounds = array<i64: 1, 128>}, {pipeline_mode = #tpu.pipeline_mode<synchronous>, transform_indices = @transform_6, window_bounds = array<i64: 8, 128>}]} {
    %c0 = arith.constant 0 : index
    %c0_0 = arith.constant 0 : index
    %0 = vector.load %arg3[%c0, %c0_0] : memref<32x128xf32, #tpu.memory_space<vmem>>, vector<32x128xf32>
    %c0_1 = arith.constant 0 : index
    %c0_2 = arith.constant 0 : index
    %1 = vector.load %arg1[%c0_1, %c0_2] : memref<64x16xf32, #tpu.memory_space<vmem>>, vector<64x16xf32>
    %c0_3 = arith.constant 0 : index
    %c0_4 = arith.constant 0 : index
    %2 = vector.load %arg2[%c0_3, %c0_4] : memref<16x128xf32, #tpu.memory_space<vmem>>, vector<16x128xf32>
    %cst = arith.constant dense<0.000000e+00> : vector<64x128xf32>
    %3 = tpu.matmul %1, %2, %cst {dimension_numbers = #tpu.dot_dimension_numbers<[1], [0], [0], [1], [0, 0, 1, 1], [], []>} : vector<64x16xf32>, vector<16x128xf32>, vector<64x128xf32> -> vector<64x128xf32>
    %c0_5 = arith.constant 0 : index
    %c0_6 = arith.constant 0 : index
    %4 = vector.load %arg4[%c0_5, %c0_6] : memref<1x128xf32, #tpu.memory_space<vmem>>, vector<1x128xf32>
    %5 = vector.broadcast %4 : vector<1x128xf32> to vector<64x128xf32>
    %6 = arith.addf %3, %5 : vector<64x128xf32>
    %7 = tpu.iota {dimensions = array<i32: 1>} : vector<1x128xi32>
    %c64_i32 = arith.constant 64 : i32
    %8 = vector.broadcast %c64_i32 : i32 to vector<1x128xi32>
    %9 = arith.cmpi sge, %7, %8 : vector<1x128xi32>
    %c96_i32 = arith.constant 96 : i32
    %10 = vector.broadcast %c96_i32 : i32 to vector<1x128xi32>
    %11 = arith.cmpi slt, %7, %10 : vector<1x128xi32>
    %12 = arith.andi %9, %11 : vector<1x128xi1>
    %cst_7 = arith.constant 1.000000e+00 : f32
    %cst_8 = arith.constant 5.000000e-01 : f32
    %13 = vector.broadcast %cst_7 : f32 to vector<1x128xf32>
    %14 = vector.broadcast %cst_8 : f32 to vector<1x128xf32>
    %15 = arith.select %12, %13, %14 : vector<1x128xi1>, vector<1x128xf32>
    %cst_9 = arith.constant 0.000000e+00 : f32
    %cst_10 = arith.constant 5.000000e-01 : f32
    %16 = vector.broadcast %cst_9 : f32 to vector<1x128xf32>
    %17 = vector.broadcast %cst_10 : f32 to vector<1x128xf32>
    %18 = arith.select %12, %16, %17 : vector<1x128xi1>, vector<1x128xf32>
    %cst_11 = arith.constant 0.000000e+00 : f32
    %19 = vector.broadcast %cst_11 : f32 to vector<8x32xf32>
    %cst_12 = arith.constant 0.000000e+00 : f32
    %20 = vector.broadcast %cst_12 : f32 to vector<8x32xf32>
    %21 = vector.extract_strided_slice %6 {offsets = [0, 0], sizes = [8, 128], strides = [1, 1]} : vector<64x128xf32> to vector<8x128xf32>
    %cst_13 = arith.constant dense<0.000000e+00> : vector<8x128xf32>
    %22 = tpu.matmul %19, %0, %cst_13 {dimension_numbers = #tpu.dot_dimension_numbers<[1], [0], [0], [1], [0, 0, 1, 1], [], []>} : vector<8x32xf32>, vector<32x128xf32>, vector<8x128xf32> -> vector<8x128xf32>
    %23 = arith.addf %21, %22 : vector<8x128xf32>
    %24 = vector.broadcast %15 : vector<1x128xf32> to vector<8x128xf32>
    %25 = arith.mulf %23, %24 : vector<8x128xf32>
    %26 = math.tanh %25 : vector<8x128xf32>
    %27 = vector.broadcast %15 : vector<1x128xf32> to vector<8x128xf32>
    %28 = arith.mulf %26, %27 : vector<8x128xf32>
    %29 = vector.broadcast %18 : vector<1x128xf32> to vector<8x128xf32>
    %30 = arith.addf %28, %29 : vector<8x128xf32>
    %31 = vector.extract_strided_slice %30 {offsets = [0, 0], sizes = [8, 32], strides = [1, 1]} : vector<8x128xf32> to vector<8x32xf32>
    %32 = vector.extract_strided_slice %30 {offsets = [0, 32], sizes = [8, 32], strides = [1, 1]} : vector<8x128xf32> to vector<8x32xf32>
    %33 = vector.extract_strided_slice %30 {offsets = [0, 64], sizes = [8, 32], strides = [1, 1]} : vector<8x128xf32> to vector<8x32xf32>
    %34 = vector.extract_strided_slice %30 {offsets = [0, 96], sizes = [8, 32], strides = [1, 1]} : vector<8x128xf32> to vector<8x32xf32>
    %35 = arith.mulf %32, %20 : vector<8x32xf32>
    %36 = arith.mulf %31, %33 : vector<8x32xf32>
    %37 = arith.addf %35, %36 : vector<8x32xf32>
    %38 = math.tanh %37 : vector<8x32xf32>
    %39 = arith.mulf %34, %38 : vector<8x32xf32>
    %40 = vector.extract_strided_slice %6 {offsets = [8, 0], sizes = [8, 128], strides = [1, 1]} : vector<64x128xf32> to vector<8x128xf32>
    %cst_14 = arith.constant dense<0.000000e+00> : vector<8x128xf32>
    %41 = tpu.matmul %39, %0, %cst_14 {dimension_numbers = #tpu.dot_dimension_numbers<[1], [0], [0], [1], [0, 0, 1, 1], [], []>} : vector<8x32xf32>, vector<32x128xf32>, vector<8x128xf32> -> vector<8x128xf32>
    %42 = arith.addf %40, %41 : vector<8x128xf32>
    %43 = vector.broadcast %15 : vector<1x128xf32> to vector<8x128xf32>
    %44 = arith.mulf %42, %43 : vector<8x128xf32>
    %45 = math.tanh %44 : vector<8x128xf32>
    %46 = vector.broadcast %15 : vector<1x128xf32> to vector<8x128xf32>
    %47 = arith.mulf %45, %46 : vector<8x128xf32>
    %48 = vector.broadcast %18 : vector<1x128xf32> to vector<8x128xf32>
    %49 = arith.addf %47, %48 : vector<8x128xf32>
    %50 = vector.extract_strided_slice %49 {offsets = [0, 0], sizes = [8, 32], strides = [1, 1]} : vector<8x128xf32> to vector<8x32xf32>
    %51 = vector.extract_strided_slice %49 {offsets = [0, 32], sizes = [8, 32], strides = [1, 1]} : vector<8x128xf32> to vector<8x32xf32>
    %52 = vector.extract_strided_slice %49 {offsets = [0, 64], sizes = [8, 32], strides = [1, 1]} : vector<8x128xf32> to vector<8x32xf32>
    %53 = vector.extract_strided_slice %49 {offsets = [0, 96], sizes = [8, 32], strides = [1, 1]} : vector<8x128xf32> to vector<8x32xf32>
    %54 = arith.mulf %51, %37 : vector<8x32xf32>
    %55 = arith.mulf %50, %52 : vector<8x32xf32>
    %56 = arith.addf %54, %55 : vector<8x32xf32>
    %57 = math.tanh %56 : vector<8x32xf32>
    %58 = arith.mulf %53, %57 : vector<8x32xf32>
    %59 = vector.extract_strided_slice %6 {offsets = [16, 0], sizes = [8, 128], strides = [1, 1]} : vector<64x128xf32> to vector<8x128xf32>
    %cst_15 = arith.constant dense<0.000000e+00> : vector<8x128xf32>
    %60 = tpu.matmul %58, %0, %cst_15 {dimension_numbers = #tpu.dot_dimension_numbers<[1], [0], [0], [1], [0, 0, 1, 1], [], []>} : vector<8x32xf32>, vector<32x128xf32>, vector<8x128xf32> -> vector<8x128xf32>
    %61 = arith.addf %59, %60 : vector<8x128xf32>
    %62 = vector.broadcast %15 : vector<1x128xf32> to vector<8x128xf32>
    %63 = arith.mulf %61, %62 : vector<8x128xf32>
    %64 = math.tanh %63 : vector<8x128xf32>
    %65 = vector.broadcast %15 : vector<1x128xf32> to vector<8x128xf32>
    %66 = arith.mulf %64, %65 : vector<8x128xf32>
    %67 = vector.broadcast %18 : vector<1x128xf32> to vector<8x128xf32>
    %68 = arith.addf %66, %67 : vector<8x128xf32>
    %69 = vector.extract_strided_slice %68 {offsets = [0, 0], sizes = [8, 32], strides = [1, 1]} : vector<8x128xf32> to vector<8x32xf32>
    %70 = vector.extract_strided_slice %68 {offsets = [0, 32], sizes = [8, 32], strides = [1, 1]} : vector<8x128xf32> to vector<8x32xf32>
    %71 = vector.extract_strided_slice %68 {offsets = [0, 64], sizes = [8, 32], strides = [1, 1]} : vector<8x128xf32> to vector<8x32xf32>
    %72 = vector.extract_strided_slice %68 {offsets = [0, 96], sizes = [8, 32], strides = [1, 1]} : vector<8x128xf32> to vector<8x32xf32>
    %73 = arith.mulf %70, %56 : vector<8x32xf32>
    %74 = arith.mulf %69, %71 : vector<8x32xf32>
    %75 = arith.addf %73, %74 : vector<8x32xf32>
    %76 = math.tanh %75 : vector<8x32xf32>
    %77 = arith.mulf %72, %76 : vector<8x32xf32>
    %78 = vector.extract_strided_slice %6 {offsets = [24, 0], sizes = [8, 128], strides = [1, 1]} : vector<64x128xf32> to vector<8x128xf32>
    %cst_16 = arith.constant dense<0.000000e+00> : vector<8x128xf32>
    %79 = tpu.matmul %77, %0, %cst_16 {dimension_numbers = #tpu.dot_dimension_numbers<[1], [0], [0], [1], [0, 0, 1, 1], [], []>} : vector<8x32xf32>, vector<32x128xf32>, vector<8x128xf32> -> vector<8x128xf32>
    %80 = arith.addf %78, %79 : vector<8x128xf32>
    %81 = vector.broadcast %15 : vector<1x128xf32> to vector<8x128xf32>
    %82 = arith.mulf %80, %81 : vector<8x128xf32>
    %83 = math.tanh %82 : vector<8x128xf32>
    %84 = vector.broadcast %15 : vector<1x128xf32> to vector<8x128xf32>
    %85 = arith.mulf %83, %84 : vector<8x128xf32>
    %86 = vector.broadcast %18 : vector<1x128xf32> to vector<8x128xf32>
    %87 = arith.addf %85, %86 : vector<8x128xf32>
    %88 = vector.extract_strided_slice %87 {offsets = [0, 0], sizes = [8, 32], strides = [1, 1]} : vector<8x128xf32> to vector<8x32xf32>
    %89 = vector.extract_strided_slice %87 {offsets = [0, 32], sizes = [8, 32], strides = [1, 1]} : vector<8x128xf32> to vector<8x32xf32>
    %90 = vector.extract_strided_slice %87 {offsets = [0, 64], sizes = [8, 32], strides = [1, 1]} : vector<8x128xf32> to vector<8x32xf32>
    %91 = vector.extract_strided_slice %87 {offsets = [0, 96], sizes = [8, 32], strides = [1, 1]} : vector<8x128xf32> to vector<8x32xf32>
    %92 = arith.mulf %89, %75 : vector<8x32xf32>
    %93 = arith.mulf %88, %90 : vector<8x32xf32>
    %94 = arith.addf %92, %93 : vector<8x32xf32>
    %95 = math.tanh %94 : vector<8x32xf32>
    %96 = arith.mulf %91, %95 : vector<8x32xf32>
    %97 = vector.extract_strided_slice %6 {offsets = [32, 0], sizes = [8, 128], strides = [1, 1]} : vector<64x128xf32> to vector<8x128xf32>
    %cst_17 = arith.constant dense<0.000000e+00> : vector<8x128xf32>
    %98 = tpu.matmul %96, %0, %cst_17 {dimension_numbers = #tpu.dot_dimension_numbers<[1], [0], [0], [1], [0, 0, 1, 1], [], []>} : vector<8x32xf32>, vector<32x128xf32>, vector<8x128xf32> -> vector<8x128xf32>
    %99 = arith.addf %97, %98 : vector<8x128xf32>
    %100 = vector.broadcast %15 : vector<1x128xf32> to vector<8x128xf32>
    %101 = arith.mulf %99, %100 : vector<8x128xf32>
    %102 = math.tanh %101 : vector<8x128xf32>
    %103 = vector.broadcast %15 : vector<1x128xf32> to vector<8x128xf32>
    %104 = arith.mulf %102, %103 : vector<8x128xf32>
    %105 = vector.broadcast %18 : vector<1x128xf32> to vector<8x128xf32>
    %106 = arith.addf %104, %105 : vector<8x128xf32>
    %107 = vector.extract_strided_slice %106 {offsets = [0, 0], sizes = [8, 32], strides = [1, 1]} : vector<8x128xf32> to vector<8x32xf32>
    %108 = vector.extract_strided_slice %106 {offsets = [0, 32], sizes = [8, 32], strides = [1, 1]} : vector<8x128xf32> to vector<8x32xf32>
    %109 = vector.extract_strided_slice %106 {offsets = [0, 64], sizes = [8, 32], strides = [1, 1]} : vector<8x128xf32> to vector<8x32xf32>
    %110 = vector.extract_strided_slice %106 {offsets = [0, 96], sizes = [8, 32], strides = [1, 1]} : vector<8x128xf32> to vector<8x32xf32>
    %111 = arith.mulf %108, %94 : vector<8x32xf32>
    %112 = arith.mulf %107, %109 : vector<8x32xf32>
    %113 = arith.addf %111, %112 : vector<8x32xf32>
    %114 = math.tanh %113 : vector<8x32xf32>
    %115 = arith.mulf %110, %114 : vector<8x32xf32>
    %116 = vector.extract_strided_slice %6 {offsets = [40, 0], sizes = [8, 128], strides = [1, 1]} : vector<64x128xf32> to vector<8x128xf32>
    %cst_18 = arith.constant dense<0.000000e+00> : vector<8x128xf32>
    %117 = tpu.matmul %115, %0, %cst_18 {dimension_numbers = #tpu.dot_dimension_numbers<[1], [0], [0], [1], [0, 0, 1, 1], [], []>} : vector<8x32xf32>, vector<32x128xf32>, vector<8x128xf32> -> vector<8x128xf32>
    %118 = arith.addf %116, %117 : vector<8x128xf32>
    %119 = vector.broadcast %15 : vector<1x128xf32> to vector<8x128xf32>
    %120 = arith.mulf %118, %119 : vector<8x128xf32>
    %121 = math.tanh %120 : vector<8x128xf32>
    %122 = vector.broadcast %15 : vector<1x128xf32> to vector<8x128xf32>
    %123 = arith.mulf %121, %122 : vector<8x128xf32>
    %124 = vector.broadcast %18 : vector<1x128xf32> to vector<8x128xf32>
    %125 = arith.addf %123, %124 : vector<8x128xf32>
    %126 = vector.extract_strided_slice %125 {offsets = [0, 0], sizes = [8, 32], strides = [1, 1]} : vector<8x128xf32> to vector<8x32xf32>
    %127 = vector.extract_strided_slice %125 {offsets = [0, 32], sizes = [8, 32], strides = [1, 1]} : vector<8x128xf32> to vector<8x32xf32>
    %128 = vector.extract_strided_slice %125 {offsets = [0, 64], sizes = [8, 32], strides = [1, 1]} : vector<8x128xf32> to vector<8x32xf32>
    %129 = vector.extract_strided_slice %125 {offsets = [0, 96], sizes = [8, 32], strides = [1, 1]} : vector<8x128xf32> to vector<8x32xf32>
    %130 = arith.mulf %127, %113 : vector<8x32xf32>
    %131 = arith.mulf %126, %128 : vector<8x32xf32>
    %132 = arith.addf %130, %131 : vector<8x32xf32>
    %133 = math.tanh %132 : vector<8x32xf32>
    %134 = arith.mulf %129, %133 : vector<8x32xf32>
    %135 = vector.extract_strided_slice %6 {offsets = [48, 0], sizes = [8, 128], strides = [1, 1]} : vector<64x128xf32> to vector<8x128xf32>
    %cst_19 = arith.constant dense<0.000000e+00> : vector<8x128xf32>
    %136 = tpu.matmul %134, %0, %cst_19 {dimension_numbers = #tpu.dot_dimension_numbers<[1], [0], [0], [1], [0, 0, 1, 1], [], []>} : vector<8x32xf32>, vector<32x128xf32>, vector<8x128xf32> -> vector<8x128xf32>
    %137 = arith.addf %135, %136 : vector<8x128xf32>
    %138 = vector.broadcast %15 : vector<1x128xf32> to vector<8x128xf32>
    %139 = arith.mulf %137, %138 : vector<8x128xf32>
    %140 = math.tanh %139 : vector<8x128xf32>
    %141 = vector.broadcast %15 : vector<1x128xf32> to vector<8x128xf32>
    %142 = arith.mulf %140, %141 : vector<8x128xf32>
    %143 = vector.broadcast %18 : vector<1x128xf32> to vector<8x128xf32>
    %144 = arith.addf %142, %143 : vector<8x128xf32>
    %145 = vector.extract_strided_slice %144 {offsets = [0, 0], sizes = [8, 32], strides = [1, 1]} : vector<8x128xf32> to vector<8x32xf32>
    %146 = vector.extract_strided_slice %144 {offsets = [0, 32], sizes = [8, 32], strides = [1, 1]} : vector<8x128xf32> to vector<8x32xf32>
    %147 = vector.extract_strided_slice %144 {offsets = [0, 64], sizes = [8, 32], strides = [1, 1]} : vector<8x128xf32> to vector<8x32xf32>
    %148 = vector.extract_strided_slice %144 {offsets = [0, 96], sizes = [8, 32], strides = [1, 1]} : vector<8x128xf32> to vector<8x32xf32>
    %149 = arith.mulf %146, %132 : vector<8x32xf32>
    %150 = arith.mulf %145, %147 : vector<8x32xf32>
    %151 = arith.addf %149, %150 : vector<8x32xf32>
    %152 = math.tanh %151 : vector<8x32xf32>
    %153 = arith.mulf %148, %152 : vector<8x32xf32>
    %154 = vector.extract_strided_slice %6 {offsets = [56, 0], sizes = [8, 128], strides = [1, 1]} : vector<64x128xf32> to vector<8x128xf32>
    %cst_20 = arith.constant dense<0.000000e+00> : vector<8x128xf32>
    %155 = tpu.matmul %153, %0, %cst_20 {dimension_numbers = #tpu.dot_dimension_numbers<[1], [0], [0], [1], [0, 0, 1, 1], [], []>} : vector<8x32xf32>, vector<32x128xf32>, vector<8x128xf32> -> vector<8x128xf32>
    %156 = arith.addf %154, %155 : vector<8x128xf32>
    %157 = vector.broadcast %15 : vector<1x128xf32> to vector<8x128xf32>
    %158 = arith.mulf %156, %157 : vector<8x128xf32>
    %159 = math.tanh %158 : vector<8x128xf32>
    %160 = vector.broadcast %15 : vector<1x128xf32> to vector<8x128xf32>
    %161 = arith.mulf %159, %160 : vector<8x128xf32>
    %162 = vector.broadcast %18 : vector<1x128xf32> to vector<8x128xf32>
    %163 = arith.addf %161, %162 : vector<8x128xf32>
    %164 = vector.extract_strided_slice %163 {offsets = [0, 0], sizes = [8, 32], strides = [1, 1]} : vector<8x128xf32> to vector<8x32xf32>
    %165 = vector.extract_strided_slice %163 {offsets = [0, 32], sizes = [8, 32], strides = [1, 1]} : vector<8x128xf32> to vector<8x32xf32>
    %166 = vector.extract_strided_slice %163 {offsets = [0, 64], sizes = [8, 32], strides = [1, 1]} : vector<8x128xf32> to vector<8x32xf32>
    %167 = vector.extract_strided_slice %163 {offsets = [0, 96], sizes = [8, 32], strides = [1, 1]} : vector<8x128xf32> to vector<8x32xf32>
    %168 = arith.mulf %165, %151 : vector<8x32xf32>
    %169 = arith.mulf %164, %166 : vector<8x32xf32>
    %170 = arith.addf %168, %169 : vector<8x32xf32>
    %171 = math.tanh %170 : vector<8x32xf32>
    %172 = arith.mulf %167, %171 : vector<8x32xf32>
    %c0_21 = arith.constant 0 : index
    %c0_22 = arith.constant 0 : index
    %173 = vector.load %arg5[%c0_21, %c0_22] : memref<32x128xf32, #tpu.memory_space<vmem>>, vector<32x128xf32>
    %cst_23 = arith.constant dense<0.000000e+00> : vector<8x128xf32>
    %174 = tpu.matmul %172, %173, %cst_23 {dimension_numbers = #tpu.dot_dimension_numbers<[1], [0], [0], [1], [0, 0, 1, 1], [], []>} : vector<8x32xf32>, vector<32x128xf32>, vector<8x128xf32> -> vector<8x128xf32>
    %c0_24 = arith.constant 0 : index
    %c0_25 = arith.constant 0 : index
    %175 = vector.load %arg6[%c0_24, %c0_25] : memref<1x128xf32, #tpu.memory_space<vmem>>, vector<1x128xf32>
    %176 = vector.broadcast %175 : vector<1x128xf32> to vector<8x128xf32>
    %177 = arith.addf %174, %176 : vector<8x128xf32>
    %c0_26 = arith.constant 0 : index
    %c0_27 = arith.constant 0 : index
    %178 = vector.load %arg7[%c0_26, %c0_27] : memref<8x128xf32, #tpu.memory_space<vmem>>, vector<8x128xf32>
    tpu.vector_store %arg7[%c0_26, %c0_27], %177 {strides = array<i32>} : memref<8x128xf32, #tpu.memory_space<vmem>>, vector<8x128xf32>,
    return
  }
  func.func @transform_0(%arg0: i32) -> (i32, i32) {
    %c0_i32 = arith.constant 0 : i32
    %c0_i32_0 = arith.constant 0 : i32
    %c0_i32_1 = arith.constant 0 : i32
    return %c0_i32, %c0_i32_0 : i32, i32
  }
  func.func @transform_1(%arg0: i32) -> (i32, i32) {
    %c0_i32 = arith.constant 0 : i32
    %c0_i32_0 = arith.constant 0 : i32
    %c0_i32_1 = arith.constant 0 : i32
    return %c0_i32, %c0_i32_0 : i32, i32
  }
  func.func @transform_2(%arg0: i32) -> (i32, i32) {
    %c0_i32 = arith.constant 0 : i32
    %c0_i32_0 = arith.constant 0 : i32
    %c0_i32_1 = arith.constant 0 : i32
    return %c0_i32, %c0_i32_0 : i32, i32
  }
  func.func @transform_3(%arg0: i32) -> (i32, i32) {
    %c0_i32 = arith.constant 0 : i32
    %c0_i32_0 = arith.constant 0 : i32
    %c0_i32_1 = arith.constant 0 : i32
    return %c0_i32, %c0_i32_0 : i32, i32
  }
  func.func @transform_4(%arg0: i32) -> (i32, i32) {
    %c0_i32 = arith.constant 0 : i32
    %c0_i32_0 = arith.constant 0 : i32
    %c0_i32_1 = arith.constant 0 : i32
    return %c0_i32, %c0_i32_0 : i32, i32
  }
  func.func @transform_5(%arg0: i32) -> (i32, i32) {
    %c0_i32 = arith.constant 0 : i32
    %c0_i32_0 = arith.constant 0 : i32
    %c0_i32_1 = arith.constant 0 : i32
    return %c0_i32, %c0_i32_0 : i32, i32
  }
  func.func @transform_6(%arg0: i32) -> (i32, i32) {
    %c0_i32 = arith.constant 0 : i32
    %c0_i32_0 = arith.constant 0 : i32
    %c0_i32_1 = arith.constant 0 : i32
    return %c0_i32, %c0_i32_0 : i32, i32
  }
}

</mosaic_0001>

<bundles_post_ra>
// kernel: lstm_model_forward.1
= control target key start
LH: loop header
LB: loop body
LE: loop exit
PB: predicated region body
PF: predicated region fallthrough
CT: control target
= control target key end

     0   :  { %vm44_vm0 = vcmask 130048   ;;  %v1331_v0 = vmov 0.0|0.0   ;;  %vm1332_vm1 = vmmov 0   ;;  %v1333_v4 = vmov 0.0   ;;  %s1336_s13 = smov 32   ;;  %s1590_s1 = inlined_call_operand.vmem [shape: f32[16,128], index: 1, kind: input, shape index: {}]   ;;  %s1591_s2 = inlined_call_operand.vmem [shape: f32[32,128], index: 2, kind: input, shape index: {}]   ;;  %s1592_s0 = inlined_call_operand.vmem [shape: f32[64,16], index: 0, kind: input, shape index: {}]   ;;  %s1593_s3 = inlined_call_operand.vmem [shape: f32[1,128], index: 3, kind: input, shape index: {}]   ;;  %s1594_s4 = inlined_call_operand.vmem [shape: f32[32,128], index: 4, kind: input, shape index: {}]   ;;  %s1595_s5 = inlined_call_operand.vmem [shape: f32[1,128], index: 5, kind: input, shape index: {}]   ;;  %s1596_s6 = inlined_call_operand.vmem [shape: f32[8,128], index: 6, kind: output, shape index: {}]  }
   0x1   :  { %1239 = vmatprep.subr.bf16.mxu1 %v1331_v0  ;;  %v35_v1 = vld [vmem:[%s1590_s1] sm:$0xff]  ;;  %v36_v2 = vld [vmem:[%s1590_s1 + $0x8] sm:$0xff]  ;;  %1144 = vmatprep.mubr.msk.f32.mxu1 %vm1332_vm1, %v1333_v4  ;;  %v25_v9 = vld [vmem:[%s1591_s2 + $0x10] sm:$0xff]  ;;  %v174_v13 = vlaneseq  ;;  %v1334_v19 = vmov 0.5   ;;  %vm181_vm5 = vcmask 261120  }
   0x2   :  { %v23_v3 = vld [vmem:[%s1591_s2] sm:$0xff]  ;;  %v1235_v5 = vpack.c.bf16 %v36_v2, %v35_v1  ;;  %v24_v6 = vld [vmem:[%s1591_s2 + $0x8] sm:$0xff]  ;;  %v26_v10 = vld [vmem:[%s1591_s2 + $0x18] sm:$0xff] }
   0x3   :  { %v27_v7 = vld [vmem:[%s1592_s0] sm:$0xff]  ;;  %v1390_v8 = vpack.c.bf16 %v24_v6, %v23_v3  ;;  %v28_v11 = vld [vmem:[%s1592_s0 + $0x8] sm:$0xff]  ;;  %v1403_v12 = vpack.c.bf16 %v26_v10, %v25_v9  ;;  %v175_v14 = vand.u32 127, %v174_v13  ;;  %v29_v51 = vld [vmem:[%s1592_s0 + $0x10] sm:$0xff] }
   0x4   :  { %1124 = vmatprep.mubr.msk.f32.mxu0 %vm44_vm0, %v27_v7  ;;  %1236 = vmatprep.subr.bf16.mxu0 %v1235_v5  ;;  %v1424_v15 = vld [vmem:[%s1593_s3] ss:$0 sm:$0xff]  ;;  %s1335_s3 = smov 64   ;;  %v30_v52 = vld [vmem:[%s1592_s0 + $0x18] sm:$0xff]  ;;  %v32_v54 = vld [vmem:[%s1592_s0 + $0x28] sm:$0xff] }
   0x5   :  { %1241 = vmatpush3.bf16.msra.mxu1 %v1390_v8  ;;  %1238 = vmatpush3.bf16.msra.mxu0 %v1235_v5  ;;  %vm176_vm2 = vcmp.ge.s32.totalorder %v175_v14, 64  ;;  %vm177_vm3 = vcmp.lt.s32.totalorder %v175_v14, 96  ;;  %v31_v53 = vld [vmem:[%s1592_s0 + $0x20] sm:$0xff]  ;;  %v33_v55 = vld [vmem:[%s1592_s0 + $0x30] sm:$0xff]  ;;  %v34_v56 = vld [vmem:[%s1592_s0 + $0x38] sm:$0xff] }
   0x6   :  { %1242 = vmatprep.subr.bf16.mxu1 %v1331_v0  ;;  %1251 = vmatprep.subr.bf16.mxu0 %v1331_v0  ;;  %vm178_vm4 = vmand %vm176_vm2, %vm177_vm3 }
   0x7   :  { %v1427_v20 = vsel %vm178_vm4, 1.0, %v1334_v19  ;;  %v1430_v26 = vsel %vm178_vm4, 0.0, %v1334_v19 }
   0x8   :  { %1125 = vmatmul.mubr.msk.f32.vlgmr.msra.gmra.mrb[0].mxu0 %vm44_vm0, %v28_v11 }
   0x9   :  { %1244 = vmatpush3.bf16.msra.mxu1 %v1403_v12  ;;  %1253 = vmatpush3.bf16.msra.mxu0 %v1390_v8 }
   0xa   :  { %1245 = vmatprep.subr.bf16.mxu1 %v1331_v0  ;;  %1254 = vmatprep.subr.bf16.mxu0 %v1331_v0 }
   0xb   :  { %1127 = vmatprep.mubr.msk.f32.mxu0 %vm44_vm0, %v29_v51 }
   0xc   :  { %1145 = vmatmul.mubr.f32.vlgmr.msra.gmra.mrb[0].mxu1 %v1333_v4  ;;  %1128 = vmatmul.mubr.msk.f32.gmra.mrb[2].mxu0 %vm44_vm0, %v30_v52 }
   0xd   :  { %1247 = vmatpush3.bf16.msra.mxu1 %v1390_v8  ;;  %1155 = vmatprep.mubr.msk.f32.mxu1 %vm1332_vm1, %v1333_v4 }
   0xe   :  { %1248 = vmatprep.subr.bf16.mxu1 %v1331_v0  ;;  %1256 = vmatpush3.bf16.msra.mxu0 %v1403_v12 }
   0xf   :  { %1263 = vmatprep.subr.bf16.mxu0 %v1331_v0  ;;  %1130 = vmatprep.mubr.msk.f32.mxu0 %vm44_vm0, %v31_v53 }
  0x10   :  { %1131 = vmatmul.mubr.msk.f32.gmra.mrb[4].mxu0 %vm44_vm0, %v32_v54 }
  0x11   :  { %1250 = vmatpush3.bf16.msra.mxu1 %v1403_v12  ;;  %1133 = vmatprep.mubr.msk.f32.mxu0 %vm44_vm0, %v33_v55 }
  0x12   :  { %1257 = vmatprep.subr.bf16.mxu1 %v1331_v0 }
  0x14   :  { %1134 = vmatmul.mubr.msk.f32.gmra.mrb[6].mxu0 %vm44_vm0, %v34_v56 }
  0x15   :  { %1166 = vmatprep.mubr.msk.f32.mxu0 %vm1332_vm1, %v1333_v4 }
  0xdb   :  { %v1126_v16 = vpop.f32.mrb[0].mxu0 }
  0xdc   :  { %v135_v17 = vpop.f32.mrb[1].mxu0  ;;  %v141_v38 = vadd.f32 %v1126_v16, %v1424_v15 }
  0xdd   :  { %v136_v18 = vadd.f32 %v1424_v15, %v135_v17 }
  0xdf   :  { %v251_v21 = vpop.f32.mrb[0].mxu1  ;;  %v1129_v60 = vpop.f32.mrb[2].mxu0 }
  0xe0   :  { %v255_v22 = vadd.f32 %v251_v21, %v136_v18  ;;  %v1146_v23 = vpop.f32.mrb[1].mxu1  ;;  %v145_v61 = vpop.f32.mrb[3].mxu0 }
  0xe1   :  { %v146_v5 = vadd.f32 %v1424_v15, %v145_v61 }
  0xe2   :  { %v256_v24 = vmul.f32 %v255_v22, %v1427_v20 }
  0xe3   :  { %v1479_v62 = vpop.f32.mrb[4].mxu0 }
  0xe4   :  { %1299 = vtanh.f32 %v256_v24  ;;  %v1481_v63 = vpop.f32.mrb[5].mxu0  ;;  %v161_v61 = vadd.f32 %v1479_v62, %v1424_v15 }
  0xe7   :  { %v1483_v1 = vpop.f32.mrb[6].mxu0 }
  0xe8   :  { %v1485_v2 = vpop.f32.mrb[7].mxu0 }
  0xee   :  { %v1300_v25 = vpop.eup %1299 }
  0xef   :  { %v258_v27 = vmul.f32 %v1300_v25, %v1427_v20 }
  0xf1   :  { %v259_v28 = vadd.f32 %v258_v27, %v1430_v26  ;;  %v151_v27 = vadd.f32 %v1129_v60, %v1424_v15 }
  0xf3   :  { %262 = vrot.lane.b32.xlu0 %v259_v28, %s1335_s3  ;;  %v260_v31 = vmul.f32 0.0, %v259_v28 }
 0x165   :  { %v263_v29 = vpop.permute.xlu0 %262 }
 0x166   :  { %v265_v30 = vmul.f32 %v263_v29, %v259_v28 }
 0x168   :  { %267 = vrot.lane.b32.xlu0 %v265_v30, %s1336_s13 }
 0x1da   :  { %v268_v32 = vpop.permute.xlu0 %267 }
 0x1db   :  { %v270_v33 = vadd.f32 %v268_v32, %v260_v31 }
 0x1dd   :  { %1301 = vtanh.f32 %v270_v33 }
 0x1e7   :  { %v1302_v34 = vpop.eup %1301 }
 0x1e8   :  { %273 = vrot.lane.b32.xlu1 %v1302_v34, %s1335_s3 }
 0x25a   :  { %v274_v35 = vpop.permute.xlu1 %273 }
 0x25b   :  { %v276_v36 = vmul.f32 %v274_v35, %v259_v28 }
 0x25d   :  { %278 = vrot.lane.b32.xlu1 %v276_v36, %s1336_s13 }
 0x2cf   :  { %v279_v37 = vpop.permute.xlu1 %278 }
 0x2d0   :  { %1156 = vmatmul.mubr.msk.f32.vlgmr.msra.gmra.mrb[2].mxu1 %vm181_vm5, %v279_v37 }
 0x2d1   :  { %1259 = vmatpush3.bf16.msra.mxu1 %v1390_v8  ;;  %1177 = vmatprep.mubr.msk.f32.mxu1 %vm1332_vm1, %v1333_v4 }
 0x2d2   :  { %1260 = vmatprep.subr.bf16.mxu1 %v1331_v0 }
 0x2d5   :  { %1262 = vmatpush3.bf16.msra.mxu1 %v1403_v12 }
 0x2d6   :  { %1269 = vmatprep.subr.bf16.mxu1 %v1331_v0 }
 0x3a3   :  { %v348_v39 = vpop.f32.mrb[2].mxu1 }
 0x3a4   :  { %v352_v40 = vadd.f32 %v348_v39, %v141_v38  ;;  %v1157_v41 = vpop.f32.mrb[3].mxu1 }
 0x3a6   :  { %v353_v42 = vmul.f32 %v352_v40, %v1427_v20 }
 0x3a8   :  { %1303 = vtanh.f32 %v353_v42 }
 0x3b2   :  { %v1304_v43 = vpop.eup %1303 }
 0x3b3   :  { %v355_v44 = vmul.f32 %v1304_v43, %v1427_v20 }
 0x3b5   :  { %v356_v45 = vadd.f32 %v355_v44, %v1430_v26  ;;  %v156_v44 = vadd.f32 %v1424_v15, %v1481_v63 }
 0x3b7   :  { %359 = vrot.lane.b32.xlu0 %v356_v45, %s1335_s3  ;;  %v357_v48 = vmul.f32 %v356_v45, %v270_v33 }
 0x429   :  { %v360_v46 = vpop.permute.xlu0 %359 }
 0x42a   :  { %v362_v47 = vmul.f32 %v360_v46, %v356_v45 }
 0x42c   :  { %364 = vrot.lane.b32.xlu1 %v362_v47, %s1336_s13 }
 0x49e   :  { %v365_v49 = vpop.permute.xlu1 %364 }
 0x49f   :  { %v367_v50 = vadd.f32 %v365_v49, %v357_v48 }
 0x4a1   :  { %1305 = vtanh.f32 %v367_v50 }
 0x4ab   :  { %v1306_v57 = vpop.eup %1305 }
 0x4ac   :  { %370 = vrot.lane.b32.xlu0 %v1306_v57, %s1335_s3 }
 0x51e   :  { %v371_v58 = vpop.permute.xlu0 %370 }
 0x51f   :  { %v373_v59 = vmul.f32 %v371_v58, %v356_v45 }
 0x521   :  { %375 = vrot.lane.b32.xlu1 %v373_v59, %s1336_s13 }
 0x593   :  { %v376_v3 = vpop.permute.xlu1 %375 }
 0x594   :  { %1167 = vmatmul.mubr.msk.f32.vlgmr.msra.gmra.mrb[8].mxu0 %vm181_vm5, %v376_v3 }
 0x595   :  { %1265 = vmatpush3.bf16.msra.mxu0 %v1390_v8  ;;  %1188 = vmatprep.mubr.msk.f32.mxu0 %vm1332_vm1, %v1333_v4 }
 0x596   :  { %1266 = vmatprep.subr.bf16.mxu0 %v1331_v0 }
 0x599   :  { %1268 = vmatpush3.bf16.msra.mxu0 %v1403_v12 }
 0x59a   :  { %1275 = vmatprep.subr.bf16.mxu0 %v1331_v0 }
 0x667   :  { %v445_v6 = vpop.f32.mrb[8].mxu0 }
 0x668   :  { %v449_v7 = vadd.f32 %v445_v6, %v146_v5  ;;  %v1168_v9 = vpop.f32.mrb[9].mxu0 }
 0x66a   :  { %v450_v10 = vmul.f32 %v449_v7, %v1427_v20 }
 0x66c   :  { %1307 = vtanh.f32 %v450_v10 }
 0x676   :  { %v1308_v11 = vpop.eup %1307 }
 0x677   :  { %v452_v13 = vmul.f32 %v1308_v11, %v1427_v20 }
 0x679   :  { %v453_v14 = vadd.f32 %v452_v13, %v1430_v26 }
 0x67b   :  { %456 = vrot.lane.b32.xlu0 %v453_v14, %s1335_s3  ;;  %v454_v18 = vmul.f32 %v453_v14, %v367_v50 }
 0x6ed   :  { %v457_v16 = vpop.permute.xlu0 %456 }
 0x6ee   :  { %v459_v17 = vmul.f32 %v457_v16, %v453_v14 }
 0x6f0   :  { %461 = vrot.lane.b32.xlu1 %v459_v17, %s1336_s13 }
 0x762   :  { %v462_v19 = vpop.permute.xlu1 %461 }
 0x763   :  { %v464_v21 = vadd.f32 %v462_v19, %v454_v18  ;;  %v166_v19 = vadd.f32 %v1424_v15, %v1485_v2 }
 0x765   :  { %1309 = vtanh.f32 %v464_v21 }
 0x76f   :  { %v1310_v22 = vpop.eup %1309 }
 0x770   :  { %467 = vrot.lane.b32.xlu0 %v1310_v22, %s1335_s3 }
 0x7e2   :  { %v468_v23 = vpop.permute.xlu0 %467 }
 0x7e3   :  { %v470_v24 = vmul.f32 %v468_v23, %v453_v14 }
 0x7e5   :  { %472 = vrot.lane.b32.xlu1 %v470_v24, %s1336_s13 }
 0x857   :  { %v473_v25 = vpop.permute.xlu1 %472 }
 0x858   :  { %1178 = vmatmul.mubr.msk.f32.vlgmr.msra.gmra.mrb[4].mxu1 %vm181_vm5, %v473_v25 }
 0x859   :  { %1271 = vmatpush3.bf16.msra.mxu1 %v1390_v8  ;;  %1199 = vmatprep.mubr.msk.f32.mxu1 %vm1332_vm1, %v1333_v4 }
 0x85a   :  { %1272 = vmatprep.subr.bf16.mxu1 %v1331_v0 }
 0x85d   :  { %1274 = vmatpush3.bf16.msra.mxu1 %v1403_v12 }
 0x85e   :  { %1281 = vmatprep.subr.bf16.mxu1 %v1331_v0 }
 0x92b   :  { %v542_v28 = vpop.f32.mrb[4].mxu1 }
 0x92c   :  { %v546_v29 = vadd.f32 %v542_v28, %v151_v27  ;;  %v1179_v30 = vpop.f32.mrb[5].mxu1 }
 0x92e   :  { %v547_v31 = vmul.f32 %v546_v29, %v1427_v20 }
 0x930   :  { %1311 = vtanh.f32 %v547_v31 }
 0x93a   :  { %v1312_v32 = vpop.eup %1311 }
 0x93b   :  { %v549_v33 = vmul.f32 %v1312_v32, %v1427_v20 }
 0x93d   :  { %v550_v34 = vadd.f32 %v549_v33, %v1430_v26 }
 0x93f   :  { %553 = vrot.lane.b32.xlu0 %v550_v34, %s1335_s3  ;;  %v551_v37 = vmul.f32 %v550_v34, %v464_v21 }
 0x9b1   :  { %v554_v35 = vpop.permute.xlu0 %553 }
 0x9b2   :  { %v556_v36 = vmul.f32 %v554_v35, %v550_v34 }
 0x9b4   :  { %558 = vrot.lane.b32.xlu1 %v556_v36, %s1336_s13  ;;  %v171_v36 = vadd.f32 %v1483_v1, %v1424_v15  ;;  %v956_v1 = vld [vmem:[%s1594_s4] sm:$0xff] }
 0xa26   :  { %v559_v38 = vpop.permute.xlu1 %558 }
 0xa27   :  { %v561_v39 = vadd.f32 %v559_v38, %v551_v37 }
 0xa29   :  { %1313 = vtanh.f32 %v561_v39 }
 0xa33   :  { %v1314_v40 = vpop.eup %1313 }
 0xa34   :  { %564 = vrot.lane.b32.xlu0 %v1314_v40, %s1335_s3 }
 0xaa6   :  { %v565_v41 = vpop.permute.xlu0 %564 }
 0xaa7   :  { %v567_v42 = vmul.f32 %v565_v41, %v550_v34 }
 0xaa9   :  { %569 = vrot.lane.b32.xlu1 %v567_v42, %s1336_s13 }
 0xb1b   :  { %v570_v43 = vpop.permute.xlu1 %569 }
 0xb1c   :  { %1189 = vmatmul.mubr.msk.f32.vlgmr.msra.gmra.mrb[10].mxu0 %vm181_vm5, %v570_v43 }
 0xb1d   :  { %1277 = vmatpush3.bf16.msra.mxu0 %v1390_v8  ;;  %1210 = vmatprep.mubr.msk.f32.mxu0 %vm1332_vm1, %v1333_v4 }
 0xb1e   :  { %1278 = vmatprep.subr.bf16.mxu0 %v1331_v0 }
 0xb21   :  { %1280 = vmatpush3.bf16.msra.mxu0 %v1403_v12 }
 0xb22   :  { %1287 = vmatprep.subr.bf16.mxu0 %v1331_v0 }
 0xbef   :  { %v639_v45 = vpop.f32.mrb[10].mxu0 }
 0xbf0   :  { %v643_v46 = vadd.f32 %v639_v45, %v156_v44  ;;  %v1190_v47 = vpop.f32.mrb[11].mxu0 }
 0xbf2   :  { %v644_v48 = vmul.f32 %v643_v46, %v1427_v20 }
 0xbf4   :  { %1315 = vtanh.f32 %v644_v48 }
 0xbfe   :  { %v1316_v49 = vpop.eup %1315 }
 0xbff   :  { %v646_v50 = vmul.f32 %v1316_v49, %v1427_v20  ;;  %v959_v49 = vld [vmem:[%s1594_s4 + $0x18] sm:$0xff] }
 0xc01   :  { %v647_v51 = vadd.f32 %v646_v50, %v1430_v26 }
 0xc03   :  { %650 = vrot.lane.b32.xlu0 %v647_v51, %s1335_s3  ;;  %v648_v54 = vmul.f32 %v647_v51, %v561_v39 }
 0xc75   :  { %v651_v52 = vpop.permute.xlu0 %650 }
 0xc76   :  { %v653_v53 = vmul.f32 %v651_v52, %v647_v51 }
 0xc78   :  { %655 = vrot.lane.b32.xlu1 %v653_v53, %s1336_s13 }
 0xcea   :  { %v656_v55 = vpop.permute.xlu1 %655 }
 0xceb   :  { %v658_v56 = vadd.f32 %v656_v55, %v648_v54  ;;  %v1063_v55 = vld [vmem:[%s1595_s5] ss:$0 sm:$0xff] }
 0xced   :  { %1317 = vtanh.f32 %v658_v56 }
 0xcf7   :  { %v1318_v57 = vpop.eup %1317 }
 0xcf8   :  { %661 = vrot.lane.b32.xlu0 %v1318_v57, %s1335_s3 }
 0xd6a   :  { %v662_v58 = vpop.permute.xlu0 %661 }
 0xd6b   :  { %v664_v59 = vmul.f32 %v662_v58, %v647_v51 }
 0xd6d   :  { %666 = vrot.lane.b32.xlu1 %v664_v59, %s1336_s13 }
 0xddf   :  { %v667_v60 = vpop.permute.xlu1 %666 }
 0xde0   :  { %1200 = vmatmul.mubr.msk.f32.vlgmr.msra.gmra.mrb[6].mxu1 %vm181_vm5, %v667_v60 }
 0xde1   :  { %1283 = vmatpush3.bf16.msra.mxu1 %v1390_v8  ;;  %1221 = vmatprep.mubr.msk.f32.mxu1 %vm1332_vm1, %v1333_v4 }
 0xde2   :  { %1284 = vmatprep.subr.bf16.mxu1 %v1331_v0 }
 0xde5   :  { %1286 = vmatpush3.bf16.msra.mxu1 %v1403_v12 }
 0xeb3   :  { %v736_v63 = vpop.f32.mrb[6].mxu1 }
 0xeb4   :  { %v740_v3 = vadd.f32 %v736_v63, %v161_v61  ;;  %v1201_v5 = vpop.f32.mrb[7].mxu1 }
 0xeb6   :  { %v741_v6 = vmul.f32 %v740_v3, %v1427_v20 }
 0xeb8   :  { %1319 = vtanh.f32 %v741_v6 }
 0xec2   :  { %v1320_v7 = vpop.eup %1319 }
 0xec3   :  { %v743_v9 = vmul.f32 %v1320_v7, %v1427_v20 }
 0xec5   :  { %v744_v8 = vadd.f32 %v743_v9, %v1430_v26 }
 0xec7   :  { %747 = vrot.lane.b32.xlu0 %v744_v8, %s1335_s3  ;;  %v745_v12 = vmul.f32 %v744_v8, %v658_v56 }
 0xf39   :  { %v748_v10 = vpop.permute.xlu0 %747 }
 0xf3a   :  { %v750_v11 = vmul.f32 %v748_v10, %v744_v8 }
 0xf3c   :  { %752 = vrot.lane.b32.xlu1 %v750_v11, %s1336_s13 }
 0xfae   :  { %v753_v13 = vpop.permute.xlu1 %752 }
 0xfaf   :  { %v755_v62 = vadd.f32 %v753_v13, %v745_v12 }
 0xfb1   :  { %1321 = vtanh.f32 %v755_v62 }
 0xfbb   :  { %v1322_v14 = vpop.eup %1321 }
 0xfbc   :  { %758 = vrot.lane.b32.xlu0 %v1322_v14, %s1335_s3 }
0x102e   :  { %v759_v16 = vpop.permute.xlu0 %758 }
0x102f   :  { %v761_v17 = vmul.f32 %v759_v16, %v744_v8 }
0x1031   :  { %763 = vrot.lane.b32.xlu1 %v761_v17, %s1336_s13 }
0x10a3   :  { %v764_v18 = vpop.permute.xlu1 %763 }
0x10a4   :  { %1211 = vmatmul.mubr.msk.f32.vlgmr.msra.gmra.mrb[12].mxu0 %vm181_vm5, %v764_v18 }
0x10a5   :  { %1232 = vmatprep.mubr.msk.f32.mxu0 %vm1332_vm1, %v1333_v4 }
0x1177   :  { %v833_v21 = vpop.f32.mrb[12].mxu0 }
0x1178   :  { %v837_v22 = vadd.f32 %v833_v21, %v166_v19  ;;  %v1212_v23 = vpop.f32.mrb[13].mxu0 }
0x117a   :  { %v838_v24 = vmul.f32 %v837_v22, %v1427_v20 }
0x117c   :  { %1323 = vtanh.f32 %v838_v24 }
0x1186   :  { %v1324_v25 = vpop.eup %1323 }
0x1187   :  { %v840_v27 = vmul.f32 %v1324_v25, %v1427_v20 }
0x1189   :  { %v841_v28 = vadd.f32 %v840_v27, %v1430_v26 }
0x118b   :  { %844 = vrot.lane.b32.xlu0 %v841_v28, %s1335_s3  ;;  %v842_v4 = vmul.f32 %v841_v28, %v755_v62 }
0x11fd   :  { %v845_v29 = vpop.permute.xlu0 %844 }
0x11fe   :  { %v847_v30 = vmul.f32 %v845_v29, %v841_v28 }
0x1200   :  { %849 = vrot.lane.b32.xlu1 %v847_v30, %s1336_s13 }
0x1272   :  { %v850_v31 = vpop.permute.xlu1 %849 }
0x1273   :  { %v852_v2 = vadd.f32 %v850_v31, %v842_v4 }
0x1275   :  { %1325 = vtanh.f32 %v852_v2 }
0x127f   :  { %v1326_v32 = vpop.eup %1325 }
0x1280   :  { %855 = vrot.lane.b32.xlu0 %v1326_v32, %s1335_s3 }
0x12f2   :  { %v856_v33 = vpop.permute.xlu0 %855 }
0x12f3   :  { %v858_v34 = vmul.f32 %v856_v33, %v841_v28 }
0x12f5   :  { %860 = vrot.lane.b32.xlu1 %v858_v34, %s1336_s13 }
0x1367   :  { %v861_v35 = vpop.permute.xlu1 %860 }
0x1368   :  { %1222 = vmatmul.mubr.msk.f32.vlgmr.msra.gmra.mrb[8].mxu1 %vm181_vm5, %v861_v35 }
0x143b   :  { %v930_v37 = vpop.f32.mrb[8].mxu1 }
0x143c   :  { %v934_v38 = vadd.f32 %v930_v37, %v171_v36  ;;  %v1223_v39 = vpop.f32.mrb[9].mxu1 }
0x143e   :  { %v935_v40 = vmul.f32 %v934_v38, %v1427_v20 }
0x1440   :  { %1327 = vtanh.f32 %v935_v40 }
0x144a   :  { %v1328_v41 = vpop.eup %1327 }
0x144b   :  { %v937_v42 = vmul.f32 %v1328_v41, %v1427_v20  ;;  %v957_v20 = vld [vmem:[%s1594_s4 + $0x8] sm:$0xff] }
0x144c   :  { %v1288_v48 = vpack.c.bf16 %v957_v20, %v956_v1 }
0x144d   :  { %v938_v43 = vadd.f32 %v937_v42, %v1430_v26  ;;  %v958_v26 = vld [vmem:[%s1594_s4 + $0x10] sm:$0xff] }
0x144e   :  { %1289 = vmatpush3.bf16.msra.mxu0 %v1288_v48  ;;  %v1291_v50 = vpack.c.bf16 %v959_v49, %v958_v26 }
0x144f   :  { %941 = vrot.lane.b32.xlu0 %v938_v43, %s1335_s3  ;;  %v939_v46 = vmul.f32 %v938_v43, %v852_v2  ;;  %1290 = vmatprep.subr.bf16.mxu0 %v1331_v0 }
0x1452   :  { %1292 = vmatpush3.bf16.msra.mxu0 %v1291_v50 }
0x14c1   :  { %v942_v44 = vpop.permute.xlu0 %941 }
0x14c2   :  { %v944_v45 = vmul.f32 %v942_v44, %v938_v43 }
0x14c4   :  { %946 = vrot.lane.b32.xlu1 %v944_v45, %s1336_s13 }
0x1536   :  { %v947_v47 = vpop.permute.xlu1 %946 }
0x1537   :  { %v949_v15 = vadd.f32 %v947_v47, %v939_v46 }
0x1539   :  { %1329 = vtanh.f32 %v949_v15 }
0x1543   :  { %v1330_v51 = vpop.eup %1329 }
0x1544   :  { %952 = vrot.lane.b32.xlu0 %v1330_v51, %s1335_s3 }
0x15b6   :  { %v953_v52 = vpop.permute.xlu0 %952 }
0x15b7   :  { %v955_v53 = vmul.f32 %v953_v52, %v938_v43 }
0x15b9   :  { %968 = vrot.lane.b32.xlu1 %v955_v53, %s1336_s13 }
0x162b   :  { %v969_v54 = vpop.permute.xlu1 %968 }
0x162c   :  { %1233 = vmatmul.mubr.msk.f32.vlgmr.msra.gmra.mrb[14].mxu0 %vm181_vm5, %v969_v54 }
0x16ff   :  { %v1038_v56 = vpop.f32.mrb[14].mxu0 }
0x1700   :  { %v1039_v57 = vadd.f32 %v1063_v55, %v1038_v56  ;;  %v1234_v58 = vpop.f32.mrb[15].mxu0 }
0x1702   :  { %1042 = vst [vmem:[%s1596_s6] sm:$0xff] %v1039_v57 }

</bundles_post_ra>
